<compile_context>
chip_gen: v7x
topology: tpu7x:2x2x1
jax: 0.10.0
libtpu: 0.0.40
codegen_flags: <defaults>
</compile_context>

<pallas_src>
import functools

import jax
import jax.numpy as jnp
from jax import lax
from jax.experimental import pallas as pl
from jax.experimental.pallas import tpu as pltpu


# ----------------------------------------------------------------------------
# Pallas kernels
# ----------------------------------------------------------------------------
def _ln_linear_ln_kernel(x_ref, g1_ref, b1_ref, w_ref, bw_ref, g2_ref, b2_ref,
                         o_ref, *, eps):
    """LayerNorm(din) -> Linear(din, dout) -> LayerNorm(dout).

    Feature dims are the true (unpadded) sizes.  LayerNorm math is f32; only
    the matmul operands are bf16 (f32 accumulation on the MXU).
    """
    x = x_ref[...].astype(jnp.float32)                        # (TM, DIN)
    din = x.shape[-1]
    mean1 = jnp.sum(x, axis=-1, keepdims=True) * (1.0 / din)
    cent1 = x - mean1
    var1 = jnp.sum(cent1 * cent1, axis=-1, keepdims=True) * (1.0 / din)
    h = (cent1 * lax.rsqrt(var1 + eps)) * g1_ref[...] + b1_ref[...]

    # bf16 x bf16 -> f32 on the MXU.
    y = jnp.dot(h.astype(jnp.bfloat16), w_ref[...],
                preferred_element_type=jnp.float32) + bw_ref[...]

    dout = y.shape[-1]
    mean2 = jnp.sum(y, axis=-1, keepdims=True) * (1.0 / dout)
    cent2 = y - mean2
    var2 = jnp.sum(cent2 * cent2, axis=-1, keepdims=True) * (1.0 / dout)
    o_ref[...] = ((cent2 * lax.rsqrt(var2 + eps)) * g2_ref[...]
                  + b2_ref[...]).astype(o_ref.dtype)


def _matmul_bias_kernel(x_ref, w_ref, b_ref, o_ref):
    o_ref[...] = (jnp.dot(x_ref[...].astype(jnp.bfloat16), w_ref[...],
                          preferred_element_type=jnp.float32)
                  + b_ref[...]).astype(o_ref.dtype)


# ----------------------------------------------------------------------------
# Row-tile selection
# ----------------------------------------------------------------------------
def _default_row_tile():
    """256 saturates the MXU M dim and amortizes per-grid-step overhead on
    v6e/v7x; v5e (4x128 MXU, lowest HBM BW) prefers 128."""
    try:
        kind = jax.devices()[0].device_kind.lower()
        if "v5 lite" in kind or "v5e" in kind or "v5litepod" in kind:
            return 128
    except Exception:  # pragma: no cover - best effort only
        pass
    return 256


def _pick_row_tile(rows, tm_max):
    """Biggest row tile <= tm_max that keeps the sublane dim a multiple of 8
    and never exceeds the array (tiny inputs use the full-array block)."""
    if rows <= 8:
        return rows
    return min(tm_max, (rows // 8) * 8)


# ----------------------------------------------------------------------------
# Pallas wrappers (no activation padding; ragged last tile handled by Pallas)
# ----------------------------------------------------------------------------
def fused_ln_linear_ln(x, g1, b1, w, bw, g2, b2, *, eps=1e-5, tm=None):
    rows, din = x.shape
    dout = w.shape[1]
    tm_max = _default_row_tile() if tm is None else tm
    tm_eff = _pick_row_tile(rows, tm_max)
    grid = (pl.cdiv(rows, tm_eff),)

    row = lambda v: v.reshape(1, -1).astype(jnp.float32)
    w_bf = w.astype(jnp.bfloat16)          # halve weight DMA bytes / VMEM

    # TODO(synk): for real configs with patch_dim >~ 2K, add a K grid axis
    # with a VMEM f32 accumulator (pl.when init/finalize) instead of loading
    # the full (din, dout) weight as one block (matters first on v7x 64 MiB).
    kernel = functools.partial(_ln_linear_ln_kernel, eps=eps)
    return pl.pallas_call(
        kernel,
        out_shape=jax.ShapeDtypeStruct((rows, dout), jnp.float32),
        grid=grid,
        in_specs=[
            pl.BlockSpec((tm_eff, din), lambda i: (i, 0)),
            pl.BlockSpec((1, din), lambda i: (0, 0)),
            pl.BlockSpec((1, din), lambda i: (0, 0)),
            pl.BlockSpec((din, dout), lambda i: (0, 0)),
            pl.BlockSpec((1, dout), lambda i: (0, 0)),
            pl.BlockSpec((1, dout), lambda i: (0, 0)),
            pl.BlockSpec((1, dout), lambda i: (0, 0)),
        ],
        out_specs=pl.BlockSpec((tm_eff, dout), lambda i: (i, 0)),
        compiler_params=pltpu.CompilerParams(
            dimension_semantics=("parallel",)),
    )(x.astype(jnp.float32), row(g1), row(b1), w_bf, row(bw), row(g2), row(b2))


def matmul_bias(x, w, b, *, tm=None):
    rows, k = x.shape
    dout = w.shape[1]
    tm_max = _default_row_tile() if tm is None else tm
    tm_eff = _pick_row_tile(rows, tm_max)
    grid = (pl.cdiv(rows, tm_eff),)

    return pl.pallas_call(
        _matmul_bias_kernel,
        out_shape=jax.ShapeDtypeStruct((rows, dout), jnp.float32),
        grid=grid,
        in_specs=[
            pl.BlockSpec((tm_eff, k), lambda i: (i, 0)),
            pl.BlockSpec((k, dout), lambda i: (0, 0)),
            pl.BlockSpec((1, dout), lambda i: (0, 0)),
        ],
        out_specs=pl.BlockSpec((tm_eff, dout), lambda i: (i, 0)),
        compiler_params=pltpu.CompilerParams(
            dimension_semantics=("parallel",)),
    )(x.astype(jnp.float32), w.astype(jnp.bfloat16),
      b.reshape(1, -1).astype(jnp.float32))


# ----------------------------------------------------------------------------
# Pure-JAX reference implementations of the two fused ops (for verification)
# ----------------------------------------------------------------------------
def _ln_ref(x, g, b, eps=1e-5):
    m = x.mean(-1, keepdims=True)
    v = ((x - m) ** 2).mean(-1, keepdims=True)
    return (x - m) / jnp.sqrt(v + eps) * g + b


def fused_ln_linear_ln_ref(x, g1, b1, w, bw, g2, b2, *, eps=1e-5):
    h = _ln_ref(x, g1, b1, eps)
    y = h @ w + bw
    return _ln_ref(y, g2, b2, eps)


def matmul_bias_ref(x, w, b):
    return x @ w + b


# ----------------------------------------------------------------------------
# Patch_embedding forward (glue = reshapes / im2col; compute = Pallas kernels)
# ----------------------------------------------------------------------------
def patch_embedding_forward(params, video, current, cfg,
                            ln_lin_ln_fn=fused_ln_linear_ln,
                            matmul_bias_fn=matmul_bias):
    C, ph, pw, pf, E, dr = (cfg["C"], cfg["ph"], cfg["pw"], cfg["pf"],
                            cfg["E"], cfg["dr"])
    B, _, F, H, W = video.shape

    # forward() hardcodes frame_patch_size=2 only for this truncation check
    if F % 2 != 0:
        video = video[:, :, :-1, :, :]
        current = current[:, :-1, :]
        F = F - 1

    f, h, w = F // pf, H // ph, W // pw

    # --- video_to_patch_embedding -------------------------------------------
    # Rearrange 'b c (f pf) (h p1) (w p2) -> b f (h w) (p1 p2 pf c)'
    vp = video.reshape(B, C, f, pf, h, ph, w, pw)
    vp = vp.transpose(0, 2, 4, 6, 5, 7, 3, 1)            # B,f,h,w,p1,p2,pf,C
    vp = vp.reshape(B * f * h * w, ph * pw * pf * C)
    v1 = ln_lin_ln_fn(vp, params["v_g1"], params["v_b1"], params["v_w"],
                      params["v_bw"], params["v_g2"], params["v_b2"])
    v1 = v1.reshape(B, f, h * w, E)

    # --- current_to_patch_embedding -----------------------------------------
    T = current.shape[1]
    cp = current.reshape(B * T, 3)
    c1 = ln_lin_ln_fn(cp, params["c_g1"], params["c_b1"], params["c_w"],
                      params["c_bw"], params["c_g2"], params["c_b2"])
    c1 = c1.reshape(B, T, E)

    # --- dilated Conv3d (stride == kernel, dilation (1, dr, dr)) --------------
    # TODO(synk): fuse this im2col gather into the Pallas matmul (scalar-
    # prefetched index tables + pl.ANY / make_async_copy) so the patch matrix
    # is never materialized in HBM; currently only the contraction is fused.
    Do = (F - pf) // pf + 1
    Ho = (H - dr * (ph - 1) - 1) // ph + 1
    Wo = (W - dr * (pw - 1) - 1) // pw + 1
    d_idx = (jnp.arange(Do)[:, None] * pf + jnp.arange(pf)[None, :]).reshape(-1)
    h_idx = (jnp.arange(Ho)[:, None] * ph + jnp.arange(ph)[None, :] * dr).reshape(-1)
    w_idx = (jnp.arange(Wo)[:, None] * pw + jnp.arange(pw)[None, :] * dr).reshape(-1)

    v = jnp.take(video, d_idx, axis=2).reshape(B, C, Do, pf, H, W)
    v = jnp.take(v, h_idx, axis=4).reshape(B, C, Do, pf, Ho, ph, W)
    v = jnp.take(v, w_idx, axis=6).reshape(B, C, Do, pf, Ho, ph, Wo, pw)
    v = v.transpose(0, 2, 4, 6, 1, 3, 5, 7)              # B,Do,Ho,Wo,C,pf,ph,pw
    v = v.reshape(B * Do * Ho * Wo, C * pf * ph * pw)

    w_mat = params["conv_w"].reshape(E, C * pf * ph * pw).T   # (K, E)
    dil = matmul_bias_fn(v, w_mat, params["conv_b"])
    dil = dil.reshape(B, Do, Ho * Wo, E)                 # 'b c f h w -> b f (h w) c'

    video_patch = jnp.concatenate([v1, dil], axis=2)
    return video_patch, c1


# ----------------------------------------------------------------------------
# Deterministic parameter init (shapes follow the PyTorch __init__)
# ----------------------------------------------------------------------------
def init_params(key, C, ph, pw, pf, E):
    patch_dim = C * ph * pw * pf
    ks = jax.random.split(key, 14)
    n = lambda k, s, sc=0.1: (jax.random.normal(k, s) * sc).astype(jnp.float32)
    return dict(
        v_g1=1.0 + n(ks[0], (patch_dim,), 0.05),
        v_b1=n(ks[1], (patch_dim,), 0.05),
        v_w=n(ks[2], (patch_dim, E), 0.1),
        v_bw=n(ks[3], (E,), 0.05),
        v_g2=1.0 + n(ks[4], (E,), 0.05),
        v_b2=n(ks[5], (E,), 0.05),
        c_g1=1.0 + n(ks[6], (3,), 0.05),
        c_b1=n(ks[7], (3,), 0.05),
        c_w=n(ks[8], (3, E), 0.1),
        c_bw=n(ks[9], (E,), 0.05),
        c_g2=1.0 + n(ks[10], (E,), 0.05),
        c_b2=n(ks[11], (E,), 0.05),
        conv_w=n(ks[12], (E, C, pf, ph, pw), 0.1),
        conv_b=n(ks[13], (E,), 0.05),
    )


if __name__ == "__main__":
    key = jax.random.PRNGKey(0)
    k_v, k_c, k_p = jax.random.split(key, 3)

    # module config: in_channels=4, image_patch_size=2, frame_patch_size=2,
    # embed_dim=32, dilation_rate=1 (-> effective dilation 2)
    B, C, F, H, W = 2, 4, 4, 8, 8
    ph = pw = 2
    pf = 2
    E = 32
    dr = 1 + 1   # dilation_rate += 1 in __init__
    cfg = dict(C=C, ph=ph, pw=pw, pf=pf, E=E, dr=dr)

    video = jax.random.normal(k_v, (B, C, F, H, W), jnp.float32)
    current = jax.random.normal(k_c, (B, F, 3), jnp.float32)
    params = init_params(k_p, C, ph, pw, pf, E)

    # Pallas forward (jitted so the reshape/transpose/take glue fuses in XLA)
    fwd = jax.jit(lambda p, v, c: patch_embedding_forward(p, v, c, cfg))
    video_patch, current_patches = fwd(params, video, current)
    jax.block_until_ready((video_patch, current_patches))

    # Pure-JAX reference with the same parameters (f32 matmul)
    vp_ref, cp_ref = patch_embedding_forward(
        params, video, current, cfg,
        ln_lin_ln_fn=fused_ln_linear_ln_ref,
        matmul_bias_fn=matmul_bias_ref)

    Ho = (H - dr * (ph - 1) - 1) // ph + 1
    Wo = (W - dr * (pw - 1) - 1) // pw + 1
    assert video_patch.shape == (B, F // pf, (H // ph) * (W // pw) + Ho * Wo, E)
    assert current_patches.shape == (B, F, E)
    # tolerance accounts for bf16 MXU operands (f32 accumulation) vs f32 ref
    assert jnp.allclose(video_patch, vp_ref, atol=2e-2, rtol=2e-2)
    assert jnp.allclose(current_patches, cp_ref, atol=2e-2, rtol=2e-2)

    print("KERNEL_OK")
</pallas_src>

<mosaic_0001>
module attributes {stable_mosaic.version = 11 : i64} {
  func.func @_matmul_bias_kernel(%arg0: i32, %arg1: memref<32x32xf32, #tpu.memory_space<vmem>>, %arg2: memref<32x32xbf16, #tpu.memory_space<vmem>>, %arg3: memref<1x32xf32, #tpu.memory_space<vmem>>, %arg4: memref<32x32xf32, #tpu.memory_space<vmem>>) attributes {dimension_semantics = [#tpu.dimension_semantics<parallel>], iteration_bounds = array<i64: 2>, scalar_prefetch = 0 : i64, scratch_operands = 0 : i64, tpu.core_type = #tpu.core_type<tc>, window_params = [{transform_indices = @transform_0, window_bounds = array<i64: 32, 32>}, {pipeline_mode = #tpu.pipeline_mode<synchronous>, transform_indices = @transform_1, window_bounds = array<i64: 32, 32>}, {pipeline_mode = #tpu.pipeline_mode<synchronous>, transform_indices = @transform_2, window_bounds = array<i64: 1, 32>}, {transform_indices = @transform_3, window_bounds = array<i64: 32, 32>}]} {
    %c0 = arith.constant 0 : index
    %c0_0 = arith.constant 0 : index
    %0 = vector.load %arg1[%c0, %c0_0] : memref<32x32xf32, #tpu.memory_space<vmem>>, vector<32x32xf32>
    %1 = arith.truncf %0 : vector<32x32xf32> to vector<32x32xbf16>
    %c0_1 = arith.constant 0 : index
    %c0_2 = arith.constant 0 : index
    %2 = vector.load %arg2[%c0_1, %c0_2] : memref<32x32xbf16, #tpu.memory_space<vmem>>, vector<32x32xbf16>
    %cst = arith.constant dense<0.000000e+00> : vector<32x32xf32>
    %3 = tpu.matmul %1, %2, %cst {dimension_numbers = #tpu.dot_dimension_numbers<[1], [0], [0], [1], [0, 0, 1, 1], [], []>} : vector<32x32xbf16>, vector<32x32xbf16>, vector<32x32xf32> -> vector<32x32xf32>
    %c0_3 = arith.constant 0 : index
    %c0_4 = arith.constant 0 : index
    %4 = vector.load %arg3[%c0_3, %c0_4] : memref<1x32xf32, #tpu.memory_space<vmem>>, vector<1x32xf32>
    %5 = vector.broadcast %4 : vector<1x32xf32> to vector<32x32xf32>
    %6 = arith.addf %3, %5 : vector<32x32xf32>
    %c0_5 = arith.constant 0 : index
    %c0_6 = arith.constant 0 : index
    %7 = vector.load %arg4[%c0_5, %c0_6] : memref<32x32xf32, #tpu.memory_space<vmem>>, vector<32x32xf32>
    tpu.vector_store %arg4[%c0_5, %c0_6], %6 {strides = array<i32>} : memref<32x32xf32, #tpu.memory_space<vmem>>, vector<32x32xf32>,
    return
  }
  func.func @transform_0(%arg0: i32) -> (i32, i32) {
    %c0_i32 = arith.constant 0 : i32
    %c0_i32_0 = arith.constant 0 : i32
    return %arg0, %c0_i32 : i32, i32
  }
  func.func @transform_1(%arg0: i32) -> (i32, i32) {
    %c0_i32 = arith.constant 0 : i32
    %c0_i32_0 = arith.constant 0 : i32
    %c0_i32_1 = arith.constant 0 : i32
    return %c0_i32, %c0_i32_0 : i32, i32
  }
  func.func @transform_2(%arg0: i32) -> (i32, i32) {
    %c0_i32 = arith.constant 0 : i32
    %c0_i32_0 = arith.constant 0 : i32
    %c0_i32_1 = arith.constant 0 : i32
    return %c0_i32, %c0_i32_0 : i32, i32
  }
  func.func @transform_3(%arg0: i32) -> (i32, i32) {
    %c0_i32 = arith.constant 0 : i32
    %c0_i32_0 = arith.constant 0 : i32
    return %arg0, %c0_i32 : i32, i32
  }
}

module attributes {stable_mosaic.version = 11 : i64} {
  func.func @_ln_linear_ln_kernel(%arg0: i32, %arg1: memref<64x32xf32, #tpu.memory_space<vmem>>, %arg2: memref<1x32xf32, #tpu.memory_space<vmem>>, %arg3: memref<1x32xf32, #tpu.memory_space<vmem>>, %arg4: memref<32x32xbf16, #tpu.memory_space<vmem>>, %arg5: memref<1x32xf32, #tpu.memory_space<vmem>>, %arg6: memref<1x32xf32, #tpu.memory_space<vmem>>, %arg7: memref<1x32xf32, #tpu.memory_space<vmem>>, %arg8: memref<64x32xf32, #tpu.memory_space<vmem>>) attributes {dimension_semantics = [#tpu.dimension_semantics<parallel>], iteration_bounds = array<i64: 1>, scalar_prefetch = 0 : i64, scratch_operands = 0 : i64, tpu.core_type = #tpu.core_type<tc>, window_params = [{transform_indices = @transform_0, window_bounds = array<i64: 64, 32>}, {pipeline_mode = #tpu.pipeline_mode<synchronous>, transform_indices = @transform_1, window_bounds = array<i64: 1, 32>}, {pipeline_mode = #tpu.pipeline_mode<synchronous>, transform_indices = @transform_2, window_bounds = array<i64: 1, 32>}, {pipeline_mode = #tpu.pipeline_mode<synchronous>, transform_indices = @transform_3, window_bounds = array<i64: 32, 32>}, {pipeline_mode = #tpu.pipeline_mode<synchronous>, transform_indices = @transform_4, window_bounds = array<i64: 1, 32>}, {pipeline_mode = #tpu.pipeline_mode<synchronous>, transform_indices = @transform_5, window_bounds = array<i64: 1, 32>}, {pipeline_mode = #tpu.pipeline_mode<synchronous>, transform_indices = @transform_6, window_bounds = array<i64: 1, 32>}, {transform_indices = @transform_7, window_bounds = array<i64: 64, 32>}]} {
    %c0 = arith.constant 0 : index
    %c0_0 = arith.constant 0 : index
    %0 = vector.load %arg1[%c0, %c0_0] : memref<64x32xf32, #tpu.memory_space<vmem>>, vector<64x32xf32>
    %cst = arith.constant dense<0.000000e+00> : vector<64xf32>
    %1 = vector.multi_reduction <add>, %0, %cst [1] : vector<64x32xf32> to vector<64xf32>
    %2 = vector.shape_cast %1 : vector<64xf32> to vector<64x1xf32>
    %cst_1 = arith.constant 3.125000e-02 : f32
    %3 = vector.broadcast %cst_1 : f32 to vector<64x1xf32>
    %4 = arith.mulf %2, %3 : vector<64x1xf32>
    %5 = vector.broadcast %4 : vector<64x1xf32> to vector<64x32xf32>
    %6 = arith.subf %0, %5 : vector<64x32xf32>
    %7 = arith.mulf %6, %6 : vector<64x32xf32>
    %cst_2 = arith.constant dense<0.000000e+00> : vector<64xf32>
    %8 = vector.multi_reduction <add>, %7, %cst_2 [1] : vector<64x32xf32> to vector<64xf32>
    %9 = vector.shape_cast %8 : vector<64xf32> to vector<64x1xf32>
    %cst_3 = arith.constant 3.125000e-02 : f32
    %10 = vector.broadcast %cst_3 : f32 to vector<64x1xf32>
    %11 = arith.mulf %9, %10 : vector<64x1xf32>
    %cst_4 = arith.constant 9.99999974E-6 : f32
    %12 = vector.broadcast %cst_4 : f32 to vector<64x1xf32>
    %13 = arith.addf %11, %12 : vector<64x1xf32>
    %14 = math.rsqrt %13 : vector<64x1xf32>
    %15 = vector.broadcast %14 : vector<64x1xf32> to vector<64x32xf32>
    %16 = arith.mulf %6, %15 : vector<64x32xf32>
    %c0_5 = arith.constant 0 : index
    %c0_6 = arith.constant 0 : index
    %17 = vector.load %arg2[%c0_5, %c0_6] : memref<1x32xf32, #tpu.memory_space<vmem>>, vector<1x32xf32>
    %18 = vector.broadcast %17 : vector<1x32xf32> to vector<64x32xf32>
    %19 = arith.mulf %16, %18 : vector<64x32xf32>
    %c0_7 = arith.constant 0 : index
    %c0_8 = arith.constant 0 : index
    %20 = vector.load %arg3[%c0_7, %c0_8] : memref<1x32xf32, #tpu.memory_space<vmem>>, vector<1x32xf32>
    %21 = vector.broadcast %20 : vector<1x32xf32> to vector<64x32xf32>
    %22 = arith.addf %19, %21 : vector<64x32xf32>
    %23 = arith.truncf %22 : vector<64x32xf32> to vector<64x32xbf16>
    %c0_9 = arith.constant 0 : index
    %c0_10 = arith.constant 0 : index
    %24 = vector.load %arg4[%c0_9, %c0_10] : memref<32x32xbf16, #tpu.memory_space<vmem>>, vector<32x32xbf16>
    %cst_11 = arith.constant dense<0.000000e+00> : vector<64x32xf32>
    %25 = tpu.matmul %23, %24, %cst_11 {dimension_numbers = #tpu.dot_dimension_numbers<[1], [0], [0], [1], [0, 0, 1, 1], [], []>} : vector<64x32xbf16>, vector<32x32xbf16>, vector<64x32xf32> -> vector<64x32xf32>
    %c0_12 = arith.constant 0 : index
    %c0_13 = arith.constant 0 : index
    %26 = vector.load %arg5[%c0_12, %c0_13] : memref<1x32xf32, #tpu.memory_space<vmem>>, vector<1x32xf32>
    %27 = vector.broadcast %26 : vector<1x32xf32> to vector<64x32xf32>
    %28 = arith.addf %25, %27 : vector<64x32xf32>
    %cst_14 = arith.constant dense<0.000000e+00> : vector<64xf32>
    %29 = vector.multi_reduction <add>, %28, %cst_14 [1] : vector<64x32xf32> to vector<64xf32>
    %30 = vector.shape_cast %29 : vector<64xf32> to vector<64x1xf32>
    %cst_15 = arith.constant 3.125000e-02 : f32
    %31 = vector.broadcast %cst_15 : f32 to vector<64x1xf32>
    %32 = arith.mulf %30, %31 : vector<64x1xf32>
    %33 = vector.broadcast %32 : vector<64x1xf32> to vector<64x32xf32>
    %34 = arith.subf %28, %33 : vector<64x32xf32>
    %35 = arith.mulf %34, %34 : vector<64x32xf32>
    %cst_16 = arith.constant dense<0.000000e+00> : vector<64xf32>
    %36 = vector.multi_reduction <add>, %35, %cst_16 [1] : vector<64x32xf32> to vector<64xf32>
    %37 = vector.shape_cast %36 : vector<64xf32> to vector<64x1xf32>
    %cst_17 = arith.constant 3.125000e-02 : f32
    %38 = vector.broadcast %cst_17 : f32 to vector<64x1xf32>
    %39 = arith.mulf %37, %38 : vector<64x1xf32>
    %cst_18 = arith.constant 9.99999974E-6 : f32
    %40 = vector.broadcast %cst_18 : f32 to vector<64x1xf32>
    %41 = arith.addf %39, %40 : vector<64x1xf32>
    %42 = math.rsqrt %41 : vector<64x1xf32>
    %43 = vector.broadcast %42 : vector<64x1xf32> to vector<64x32xf32>
    %44 = arith.mulf %34, %43 : vector<64x32xf32>
    %c0_19 = arith.constant 0 : index
    %c0_20 = arith.constant 0 : index
    %45 = vector.load %arg6[%c0_19, %c0_20] : memref<1x32xf32, #tpu.memory_space<vmem>>, vector<1x32xf32>
    %46 = vector.broadcast %45 : vector<1x32xf32> to vector<64x32xf32>
    %47 = arith.mulf %44, %46 : vector<64x32xf32>
    %c0_21 = arith.constant 0 : index
    %c0_22 = arith.constant 0 : index
    %48 = vector.load %arg7[%c0_21, %c0_22] : memref<1x32xf32, #tpu.memory_space<vmem>>, vector<1x32xf32>
    %49 = vector.broadcast %48 : vector<1x32xf32> to vector<64x32xf32>
    %50 = arith.addf %47, %49 : vector<64x32xf32>
    %c0_23 = arith.constant 0 : index
    %c0_24 = arith.constant 0 : index
    %51 = vector.load %arg8[%c0_23, %c0_24] : memref<64x32xf32, #tpu.memory_space<vmem>>, vector<64x32xf32>
    tpu.vector_store %arg8[%c0_23, %c0_24], %50 {strides = array<i32>} : memref<64x32xf32, #tpu.memory_space<vmem>>, vector<64x32xf32>,
    return
  }
  func.func @transform_0(%arg0: i32) -> (i32, i32) {
    %c0_i32 = arith.constant 0 : i32
    %c0_i32_0 = arith.constant 0 : i32
    return %arg0, %c0_i32 : i32, i32
  }
  func.func @transform_1(%arg0: i32) -> (i32, i32) {
    %c0_i32 = arith.constant 0 : i32
    %c0_i32_0 = arith.constant 0 : i32
    %c0_i32_1 = arith.constant 0 : i32
    return %c0_i32, %c0_i32_0 : i32, i32
  }
  func.func @transform_2(%arg0: i32) -> (i32, i32) {
    %c0_i32 = arith.constant 0 : i32
    %c0_i32_0 = arith.constant 0 : i32
    %c0_i32_1 = arith.constant 0 : i32
    return %c0_i32, %c0_i32_0 : i32, i32
  }
  func.func @transform_3(%arg0: i32) -> (i32, i32) {
    %c0_i32 = arith.constant 0 : i32
    %c0_i32_0 = arith.constant 0 : i32
    %c0_i32_1 = arith.constant 0 : i32
    return %c0_i32, %c0_i32_0 : i32, i32
  }
  func.func @transform_4(%arg0: i32) -> (i32, i32) {
    %c0_i32 = arith.constant 0 : i32
    %c0_i32_0 = arith.constant 0 : i32
    %c0_i32_1 = arith.constant 0 : i32
    return %c0_i32, %c0_i32_0 : i32, i32
  }
  func.func @transform_5(%arg0: i32) -> (i32, i32) {
    %c0_i32 = arith.constant 0 : i32
    %c0_i32_0 = arith.constant 0 : i32
    %c0_i32_1 = arith.constant 0 : i32
    return %c0_i32, %c0_i32_0 : i32, i32
  }
  func.func @transform_6(%arg0: i32) -> (i32, i32) {
    %c0_i32 = arith.constant 0 : i32
    %c0_i32_0 = arith.constant 0 : i32
    %c0_i32_1 = arith.constant 0 : i32
    return %c0_i32, %c0_i32_0 : i32, i32
  }
  func.func @transform_7(%arg0: i32) -> (i32, i32) {
    %c0_i32 = arith.constant 0 : i32
    %c0_i32_0 = arith.constant 0 : i32
    return %arg0, %c0_i32 : i32, i32
  }
}

module attributes {stable_mosaic.version = 11 : i64} {
  func.func @_ln_linear_ln_kernel(%arg0: i32, %arg1: memref<8x3xf32, #tpu.memory_space<vmem>>, %arg2: memref<1x3xf32, #tpu.memory_space<vmem>>, %arg3: memref<1x3xf32, #tpu.memory_space<vmem>>, %arg4: memref<3x32xbf16, #tpu.memory_space<vmem>>, %arg5: memref<1x32xf32, #tpu.memory_space<vmem>>, %arg6: memref<1x32xf32, #tpu.memory_space<vmem>>, %arg7: memref<1x32xf32, #tpu.memory_space<vmem>>, %arg8: memref<8x32xf32, #tpu.memory_space<vmem>>) attributes {dimension_semantics = [#tpu.dimension_semantics<parallel>], iteration_bounds = array<i64: 1>, scalar_prefetch = 0 : i64, scratch_operands = 0 : i64, tpu.core_type = #tpu.core_type<tc>, window_params = [{transform_indices = @transform_0, window_bounds = array<i64: 8, 3>}, {pipeline_mode = #tpu.pipeline_mode<synchronous>, transform_indices = @transform_1, window_bounds = array<i64: 1, 3>}, {pipeline_mode = #tpu.pipeline_mode<synchronous>, transform_indices = @transform_2, window_bounds = array<i64: 1, 3>}, {pipeline_mode = #tpu.pipeline_mode<synchronous>, transform_indices = @transform_3, window_bounds = array<i64: 3, 32>}, {pipeline_mode = #tpu.pipeline_mode<synchronous>, transform_indices = @transform_4, window_bounds = array<i64: 1, 32>}, {pipeline_mode = #tpu.pipeline_mode<synchronous>, transform_indices = @transform_5, window_bounds = array<i64: 1, 32>}, {pipeline_mode = #tpu.pipeline_mode<synchronous>, transform_indices = @transform_6, window_bounds = array<i64: 1, 32>}, {transform_indices = @transform_7, window_bounds = array<i64: 8, 32>}]} {
    %c0 = arith.constant 0 : index
    %c0_0 = arith.constant 0 : index
    %0 = vector.load %arg1[%c0, %c0_0] : memref<8x3xf32, #tpu.memory_space<vmem>>, vector<8x3xf32>
    %cst = arith.constant dense<0.000000e+00> : vector<8xf32>
    %1 = vector.multi_reduction <add>, %0, %cst [1] : vector<8x3xf32> to vector<8xf32>
    %2 = vector.shape_cast %1 : vector<8xf32> to vector<8x1xf32>
    %cst_1 = arith.constant 0.333333343 : f32
    %3 = vector.broadcast %cst_1 : f32 to vector<8x1xf32>
    %4 = arith.mulf %2, %3 : vector<8x1xf32>
    %5 = vector.broadcast %4 : vector<8x1xf32> to vector<8x3xf32>
    %6 = arith.subf %0, %5 : vector<8x3xf32>
    %7 = arith.mulf %6, %6 : vector<8x3xf32>
    %cst_2 = arith.constant dense<0.000000e+00> : vector<8xf32>
    %8 = vector.multi_reduction <add>, %7, %cst_2 [1] : vector<8x3xf32> to vector<8xf32>
    %9 = vector.shape_cast %8 : vector<8xf32> to vector<8x1xf32>
    %cst_3 = arith.constant 0.333333343 : f32
    %10 = vector.broadcast %cst_3 : f32 to vector<8x1xf32>
    %11 = arith.mulf %9, %10 : vector<8x1xf32>
    %cst_4 = arith.constant 9.99999974E-6 : f32
    %12 = vector.broadcast %cst_4 : f32 to vector<8x1xf32>
    %13 = arith.addf %11, %12 : vector<8x1xf32>
    %14 = math.rsqrt %13 : vector<8x1xf32>
    %15 = vector.broadcast %14 : vector<8x1xf32> to vector<8x3xf32>
    %16 = arith.mulf %6, %15 : vector<8x3xf32>
    %c0_5 = arith.constant 0 : index
    %c0_6 = arith.constant 0 : index
    %17 = vector.load %arg2[%c0_5, %c0_6] : memref<1x3xf32, #tpu.memory_space<vmem>>, vector<1x3xf32>
    %18 = vector.broadcast %17 : vector<1x3xf32> to vector<8x3xf32>
    %19 = arith.mulf %16, %18 : vector<8x3xf32>
    %c0_7 = arith.constant 0 : index
    %c0_8 = arith.constant 0 : index
    %20 = vector.load %arg3[%c0_7, %c0_8] : memref<1x3xf32, #tpu.memory_space<vmem>>, vector<1x3xf32>
    %21 = vector.broadcast %20 : vector<1x3xf32> to vector<8x3xf32>
    %22 = arith.addf %19, %21 : vector<8x3xf32>
    %23 = arith.truncf %22 : vector<8x3xf32> to vector<8x3xbf16>
    %c0_9 = arith.constant 0 : index
    %c0_10 = arith.constant 0 : index
    %24 = vector.load %arg4[%c0_9, %c0_10] : memref<3x32xbf16, #tpu.memory_space<vmem>>, vector<3x32xbf16>
    %cst_11 = arith.constant dense<0.000000e+00> : vector<8x32xf32>
    %25 = tpu.matmul %23, %24, %cst_11 {dimension_numbers = #tpu.dot_dimension_numbers<[1], [0], [0], [1], [0, 0, 1, 1], [], []>} : vector<8x3xbf16>, vector<3x32xbf16>, vector<8x32xf32> -> vector<8x32xf32>
    %c0_12 = arith.constant 0 : index
    %c0_13 = arith.constant 0 : index
    %26 = vector.load %arg5[%c0_12, %c0_13] : memref<1x32xf32, #tpu.memory_space<vmem>>, vector<1x32xf32>
    %27 = vector.broadcast %26 : vector<1x32xf32> to vector<8x32xf32>
    %28 = arith.addf %25, %27 : vector<8x32xf32>
    %cst_14 = arith.constant dense<0.000000e+00> : vector<8xf32>
    %29 = vector.multi_reduction <add>, %28, %cst_14 [1] : vector<8x32xf32> to vector<8xf32>
    %30 = vector.shape_cast %29 : vector<8xf32> to vector<8x1xf32>
    %cst_15 = arith.constant 3.125000e-02 : f32
    %31 = vector.broadcast %cst_15 : f32 to vector<8x1xf32>
    %32 = arith.mulf %30, %31 : vector<8x1xf32>
    %33 = vector.broadcast %32 : vector<8x1xf32> to vector<8x32xf32>
    %34 = arith.subf %28, %33 : vector<8x32xf32>
    %35 = arith.mulf %34, %34 : vector<8x32xf32>
    %cst_16 = arith.constant dense<0.000000e+00> : vector<8xf32>
    %36 = vector.multi_reduction <add>, %35, %cst_16 [1] : vector<8x32xf32> to vector<8xf32>
    %37 = vector.shape_cast %36 : vector<8xf32> to vector<8x1xf32>
    %cst_17 = arith.constant 3.125000e-02 : f32
    %38 = vector.broadcast %cst_17 : f32 to vector<8x1xf32>
    %39 = arith.mulf %37, %38 : vector<8x1xf32>
    %cst_18 = arith.constant 9.99999974E-6 : f32
    %40 = vector.broadcast %cst_18 : f32 to vector<8x1xf32>
    %41 = arith.addf %39, %40 : vector<8x1xf32>
    %42 = math.rsqrt %41 : vector<8x1xf32>
    %43 = vector.broadcast %42 : vector<8x1xf32> to vector<8x32xf32>
    %44 = arith.mulf %34, %43 : vector<8x32xf32>
    %c0_19 = arith.constant 0 : index
    %c0_20 = arith.constant 0 : index
    %45 = vector.load %arg6[%c0_19, %c0_20] : memref<1x32xf32, #tpu.memory_space<vmem>>, vector<1x32xf32>
    %46 = vector.broadcast %45 : vector<1x32xf32> to vector<8x32xf32>
    %47 = arith.mulf %44, %46 : vector<8x32xf32>
    %c0_21 = arith.constant 0 : index
    %c0_22 = arith.constant 0 : index
    %48 = vector.load %arg7[%c0_21, %c0_22] : memref<1x32xf32, #tpu.memory_space<vmem>>, vector<1x32xf32>
    %49 = vector.broadcast %48 : vector<1x32xf32> to vector<8x32xf32>
    %50 = arith.addf %47, %49 : vector<8x32xf32>
    %c0_23 = arith.constant 0 : index
    %c0_24 = arith.constant 0 : index
    %51 = vector.load %arg8[%c0_23, %c0_24] : memref<8x32xf32, #tpu.memory_space<vmem>>, vector<8x32xf32>
    tpu.vector_store %arg8[%c0_23, %c0_24], %50 {strides = array<i32>} : memref<8x32xf32, #tpu.memory_space<vmem>>, vector<8x32xf32>,
    return
  }
  func.func @transform_0(%arg0: i32) -> (i32, i32) {
    %c0_i32 = arith.constant 0 : i32
    %c0_i32_0 = arith.constant 0 : i32
    return %arg0, %c0_i32 : i32, i32
  }
  func.func @transform_1(%arg0: i32) -> (i32, i32) {
    %c0_i32 = arith.constant 0 : i32
    %c0_i32_0 = arith.constant 0 : i32
    %c0_i32_1 = arith.constant 0 : i32
    return %c0_i32, %c0_i32_0 : i32, i32
  }
  func.func @transform_2(%arg0: i32) -> (i32, i32) {
    %c0_i32 = arith.constant 0 : i32
    %c0_i32_0 = arith.constant 0 : i32
    %c0_i32_1 = arith.constant 0 : i32
    return %c0_i32, %c0_i32_0 : i32, i32
  }
  func.func @transform_3(%arg0: i32) -> (i32, i32) {
    %c0_i32 = arith.constant 0 : i32
    %c0_i32_0 = arith.constant 0 : i32
    %c0_i32_1 = arith.constant 0 : i32
    return %c0_i32, %c0_i32_0 : i32, i32
  }
  func.func @transform_4(%arg0: i32) -> (i32, i32) {
    %c0_i32 = arith.constant 0 : i32
    %c0_i32_0 = arith.constant 0 : i32
    %c0_i32_1 = arith.constant 0 : i32
    return %c0_i32, %c0_i32_0 : i32, i32
  }
  func.func @transform_5(%arg0: i32) -> (i32, i32) {
    %c0_i32 = arith.constant 0 : i32
    %c0_i32_0 = arith.constant 0 : i32
    %c0_i32_1 = arith.constant 0 : i32
    return %c0_i32, %c0_i32_0 : i32, i32
  }
  func.func @transform_6(%arg0: i32) -> (i32, i32) {
    %c0_i32 = arith.constant 0 : i32
    %c0_i32_0 = arith.constant 0 : i32
    %c0_i32_1 = arith.constant 0 : i32
    return %c0_i32, %c0_i32_0 : i32, i32
  }
  func.func @transform_7(%arg0: i32) -> (i32, i32) {
    %c0_i32 = arith.constant 0 : i32
    %c0_i32_0 = arith.constant 0 : i32
    return %arg0, %c0_i32 : i32, i32
  }
}

</mosaic_0001>

<bundles_post_ra>
// kernel: _lambda_.5
= control target key start
LH: loop header
LB: loop body
LE: loop exit
PB: predicated region body
PF: predicated region fallthrough
CT: control target
= control target key end

     0   :  { %s751_s12 = smov 0   ;;  %s753_s13 = smov 0   ;;  %s866_s0 = inlined_call_operand.vmem [shape: f32[36,32], index: 0, kind: input, shape index: {}]   ;;  %s867_s1 = inlined_call_operand.vmem [shape: bf16[32,32], index: 1, kind: input, shape index: {}]   ;;  %s868_s2 = inlined_call_operand.vmem [shape: f32[1,32], index: 2, kind: input, shape index: {}]   ;;  %s869_s3 = inlined_call_operand.vmem [shape: f32[36,32], index: 3, kind: output, shape index: {}]  }
   0x1   :  { %s755_s14 = smov 0  }
   0x2 LB: > { %s764_s15 = sadd.s32 4294967295, %s697_s14   ;;  %s766_s16 = sadd.s32 1, %s697_s14   ;;  %s697_s14 = sphi %s755_s14, %s876_s14   ;;  %s693_s13 = sphi %s753_s13, %s875_s13   ;;  %s689_s12 = sphi %s751_s12, %s874_s12  }
   0x3   : > { %s85_s17 = ssub.s32 %s697_s14, %s766_s16  ;;  %s88_s18 = sadd.s32 1, %s693_s13 }
   0x4   : > { %p86_p0 = scmp.eq.s32.totalorder %s85_s17, 0  ;;  %p98_p1 = scmp.ne.s32.totalorder %s693_s13, %s689_s12 }
   0x5   : > { %p99_p2 = scmp.eq.s32.totalorder %s764_s15, 1  ;;  %p512_p3 = scmp.ge.s32.totalorder %s697_s14, 1 }
   0x6   : > { %s774_s19 = scalar_select %p86_p0, %s693_s13, %s88_s18  }
   0x7   : > { %p776_p4 = por %p99_p2, %p98_p1  ;;  %p146_p5 = scmp.lt.s32.totalorder %s697_s14, 3 }
   0x9   : > { %p147_p6 = pnand %p512_p3, %p146_p5 }
   0xa   : > { %v641_v0 = vld [vmem:[%s867_s1] sm:$0xff] (!%p147_p6)   ;;  %s784_s23 = sshll.u32 (!%p147_p6), %s764_s15, 2  ;;  %v642_v1 = vld [vmem:[%s867_s1 + $0x8] sm:$0xff] (!%p147_p6)   ;;  %vm222_vm0 = vcmask (!%p147_p6), 261120   ;;  %s170_s4 = sand.u32 (!%p147_p6), 1, %s689_s12  }
   0xb   : > { %150 = sbr.rel (%p147_p6) target bundleno = 293 (0x125), region = 32  ;;  %p178_p7 = scmp.lt.s32.totalorder (!%p147_p6), %s784_s23, 4  ;;  %545 = vmatprep.subr.bf16.mxu0 (!%p147_p6), %v641_v0  ;;  %v516_v8 = vld [vmem:[%s868_s2] ss:$0 sm:$0xff] (!%p147_p6) }
   0xc   : > { %546 = vmatpush3.bf16.msra.mxu0 (!%p147_p6), %v641_v0  ;;  %s513_s5 = sshll.u32 (!%p147_p6), %s170_s4, 5 }
   0xd   : > { %547 = vmatprep.subr.bf16.mxu0 (!%p147_p6), %v642_v1  ;;  %s800_s8 = scalar_lea.vmem (!%p147_p6), [#allocation2], %s513_s5  }
  0x10   : > { %548 = vmatpush3.bf16.msra.mxu0 (!%p147_p6), %v642_v1 }
  0x12   : > { %s179_s26 = scalar_select %p178_p7, %s784_s23, 4 }
  0x13   : > { %s290_s9 = ssub.s32 (%p776_p4), 5, %s784_s23  ;;  %s538_s10 = sshll.u32 (%p776_p4), %s764_s15, 5 }
  0x14   : > { %s515_s27 = sshll.u32 %s179_s26, 3  ;;  %p291_p8 = scmp.lt.s32.totalorder (%p776_p4), %s290_s9, 4 }
  0x15   : > { %s181_s30 = scalar_lea.vmem %s866_s0, %s515_s27  ;;  %s817_s14 = scalar_lea.vmem (%p776_p4), %s869_s3, %s538_s10  }
  0x16   : > { %v193_v2 = vld [vmem:[%s181_s30] sm:$0xff]  ;;  %v194_v3 = vld [vmem:[%s181_s30 + $0x8] sm:$0xff]  ;;  %v195_v4 = vld [vmem:[%s181_s30 + $0x10] sm:$0xff] }
  0x17   : > { %v197_v5 = vpack.c.bf16 %v194_v3, %v193_v2  ;;  %v196_v6 = vld [vmem:[%s181_s30 + $0x18] sm:$0xff] }
  0x18   : > { %v198_v7 = vpack.c.bf16 %v196_v6, %v195_v4 }
  0x19   : > { %549 = vmatprep.mubr.msk.bf16.mxu0 %vm222_vm0, %v197_v5 }
  0x1a   : > { %550 = vmatmul.mubr.msk.bf16.vlgmr.msra.gmra.mrb[0].mxu0 %vm222_vm0, %v198_v7 }
  0xed   : > { %v551_v9 = vpop.f32.mrb[0].mxu0  ;;  %288 = sbr.rel (!%p776_p4) target bundleno = 293 (0x125), region = 36 }
  0xee   : > { %v272_v10 = vadd.f32 %v551_v9, %v516_v8  ;;  %v263_v11 = vpop.f32.mrb[1].mxu0 }
  0xef   : > { %v264_v12 = vadd.f32 %v516_v8, %v263_v11  ;;  %v552_v13 = vpop.f32.mrb[2].mxu0 }
  0xf0   : > { %280 = vst.msk [vmem:[%s800_s8 + $0x10] sm:$0xff] %vm222_vm0, %v272_v10  ;;  %v275_v14 = vadd.f32 %v552_v13, %v516_v8  ;;  %v266_v15 = vpop.f32.mrb[3].mxu0 }
  0xf1   : > { %278 = vst.msk [vmem:[%s800_s8] sm:$0xff] %vm222_vm0, %v264_v12  ;;  %v267_v16 = vadd.f32 %v516_v8, %v266_v15 }
  0xf2   : > { %281 = vst.msk [vmem:[%s800_s8 + $0x18] sm:$0xff] %vm222_vm0, %v275_v14 }
  0xf3   : > { %279 = vst.msk [vmem:[%s800_s8 + $0x8] sm:$0xff] %vm222_vm0, %v267_v16 }
  0xf4   : > { %s878_s9 = smov (!%p291_p8, %s290_s9), 4 }
  0xf5   : > { %s523_s17 = sshll.u32 %s878_s9, 7 }
  0xf6   : > { %p526_p9 = scmp.eq.s32.totalorder %s523_s17, 0 }
  0xf7   : > { %s823_s18 = sshrl.u32 (!%p526_p9), %s878_s9, 2 }
  0xf8   : > { %299 = sbr.rel (%p526_p9) target bundleno = 293 (0x125), region = 40  ;;  %p527_p10 = scmp.le.s32.totalorder (!%p526_p9), %s823_s18, 0 }
  0xff   : > { %465 = sbr.rel (%p527_p10) target bundleno = 272 (0x110), region = 116  ;;  %s871_s15 = smov (!%p527_p10), %s817_s14 }
 0x100   : > { %s872_s20 = smov (!%p527_p10), %s800_s8  ;;  %s832_s21 = smov (!%p527_p10), 0  }
 0x101   : > { %s711_s22 = smov (!%p527_p10), 0  }
 0x106 LB: >> { %v367_v17 = vld [vmem:[%s705_s20] sm:$0xff]  ;;  %v369_v18 = vld [vmem:[%s705_s20 + $0x8] sm:$0xff]  ;;  %v371_v19 = vld [vmem:[%s705_s20 + $0x10] sm:$0xff]  ;;  %s375_s23 = sadd.s32 1, %s709_s21  ;;  %s361_s22 = sadd.s32 1, %s713_s22   ;;  %s713_s22 = sphi %s711_s22, %s361_s22   ;;  %s709_s21 = sphi %s832_s21, %s873_s21   ;;  %s705_s20 = sphi %s872_s20, %s380_s20   ;;  %s701_s15 = sphi %s871_s15, %s381_s15  }
 0x107   : >> { %368 = vst [vmem:[%s701_s15] sm:$0xff] %v367_v17  ;;  %370 = vst [vmem:[%s701_s15 + $0x8] sm:$0xff] %v369_v18  ;;  %v373_v20 = vld [vmem:[%s705_s20 + $0x18] sm:$0xff]  ;;  %p376_p11 = scmp.ge.s32.totalorder %s375_s23, %s823_s18  ;;  %p360_p12 = scmp.ge.s32.totalorder %s361_s22, %s823_s18 }
 0x108   : >> { %372 = vst [vmem:[%s701_s15 + $0x10] sm:$0xff] %v371_v19  ;;  %374 = vst [vmem:[%s701_s15 + $0x18] sm:$0xff] %v373_v20 }
 0x109   : >> { %s880_s23 = smov (%p376_p11, %s375_s23), 0  ;;  %363 = sbr.rel (!%p360_p12) target bundleno = 262 (0x106), region = 122 }
 0x10a   : >> { %s528_s24 = sshll.u32 %s880_s23, 5  ;;  %s873_s21 = smov %s880_s23 }
 0x10b   : >> { %s380_s20 = scalar_lea.vmem %s800_s8, %s528_s24 [#allocation2]   ;;  %s381_s15 = scalar_lea.vmem %s817_s14, %s528_s24  }
 0x110 PF: > { %s848_s25 = sand.u32 3, %s878_s9   ;;  %s539_s26 = sshll.u32 %s823_s18, 5 }
 0x111   : > { %s386_s27 = scalar_lea.vmem %s800_s8, %s539_s26 [#allocation2]   ;;  %s388_s28 = scalar_lea.vmem %s817_s14, %s539_s26  }
 0x112   : > { %p533_p13 = scmp.le.s32.totalorder %s848_s25, 0 }
 0x113   : > { %s715_s29 = smov (!%p533_p13), %s388_s28   ;;  %s719_s30 = smov (!%p533_p13), %s386_s27  }
 0x114   : > { %479 = sbr.rel (%p533_p13) target bundleno = 293 (0x125), region = 127  ;;  %s723_s4 = smov (!%p533_p13), 0  }
 0x115   : > { %s727_s5 = smov (!%p533_p13), 0  }
 0x11b LB: >> { %v398_v21 = vld [vmem:[%s721_s30] sm:$0xff]  ;;  %s400_s6 = sadd.s32 1, %s725_s4  ;;  %s392_s5 = sadd.s32 1, %s729_s5   ;;  %s729_s5 = sphi %s727_s5, %s392_s5   ;;  %s725_s4 = sphi %s723_s4, %s724_s4   ;;  %s721_s30 = sphi %s719_s30, %s405_s30   ;;  %s717_s29 = sphi %s715_s29, %s406_s29  }
 0x11c   : >> { %399 = vst [vmem:[%s717_s29] sm:$0xff] %v398_v21  ;;  %p401_p0 = scmp.ge.s32.totalorder %s400_s6, %s848_s25  ;;  %p391_p1 = scmp.ge.s32.totalorder %s392_s5, %s848_s25 }
 0x11e   : >> { %s882_s6 = smov (%p401_p0, %s400_s6), 0  ;;  %394 = sbr.rel (!%p391_p1) target bundleno = 283 (0x11b), region = 133 }
 0x11f   : >> { %s534_s7 = sshll.u32 %s882_s6, 3  ;;  %s724_s4 = smov %s882_s6  }
 0x120   : >> { %s405_s30 = scalar_lea.vmem %s386_s27, %s534_s7 [#allocation2]   ;;  %s406_s29 = scalar_lea.vmem %s388_s28, %s534_s7  }
 0x125 PF: > { %p10_p2 = scmp.ge.s32.totalorder %s766_s16, 4   ;;  %s874_s12 = smov %s693_s13 }
 0x126   : > { %s875_s13 = smov %s774_s19  ;;  %s876_s14 = smov %s766_s16 }
 0x127   :  { %12 = sbr.rel (!%p10_p2) target bundleno = 2 (0x2), region = 144 }

// kernel: _lambda_.3
= control target key start
LH: loop header
LB: loop body
LE: loop exit
PB: predicated region body
PF: predicated region fallthrough
CT: control target
= control target key end

     0   :  { %vm35_vm0 = vcmask 261120   ;;  %s720_s0 = inlined_call_operand.vmem [shape: f32[64,32], index: 0, kind: input, shape index: {}]   ;;  %s721_s3 = inlined_call_operand.vmem [shape: bf16[32,32], index: 3, kind: input, shape index: {}]   ;;  %s722_s1 = inlined_call_operand.vmem [shape: f32[1,32], index: 1, kind: input, shape index: {}]   ;;  %s723_s2 = inlined_call_operand.vmem [shape: f32[1,32], index: 2, kind: input, shape index: {}]   ;;  %s724_s4 = inlined_call_operand.vmem [shape: f32[1,32], index: 4, kind: input, shape index: {}]   ;;  %s725_s5 = inlined_call_operand.vmem [shape: f32[1,32], index: 5, kind: input, shape index: {}]   ;;  %s726_s6 = inlined_call_operand.vmem [shape: f32[1,32], index: 6, kind: input, shape index: {}]   ;;  %s727_s7 = inlined_call_operand.vmem [shape: f32[64,32], index: 7, kind: output, shape index: {}]  }
   0x1   :  { %v27_v0 = vld [vmem:[%s720_s0] sm:$0xff]  ;;  %v28_v2 = vld [vmem:[%s720_s0 + $0x8] sm:$0xff]  ;;  %v29_v8 = vld [vmem:[%s720_s0 + $0x10] sm:$0xff] }
   0x2   :  { %v31_v1 = vld [vmem:[%s720_s0 + $0x20] sm:$0xff]  ;;  %v36_v3 = vsel %vm35_vm0, %v27_v0, 0.0  ;;  %v32_v5 = vld [vmem:[%s720_s0 + $0x28] sm:$0xff]  ;;  %v39_v6 = vsel %vm35_vm0, %v28_v2, 0.0  ;;  %v30_v9 = vld [vmem:[%s720_s0 + $0x18] sm:$0xff]  ;;  %v42_v10 = vsel %vm35_vm0, %v29_v8, 0.0 }
   0x3   :  { %v48_v4 = vsel %vm35_vm0, %v31_v1, 0.0  ;;  %37 = vadd.xlane.f32.xlu0 %v36_v3  ;;  %v51_v7 = vsel %vm35_vm0, %v32_v5, 0.0  ;;  %v45_v11 = vsel %vm35_vm0, %v30_v9, 0.0  ;;  %v33_v12 = vld [vmem:[%s720_s0 + $0x30] sm:$0xff]  ;;  %v34_v13 = vld [vmem:[%s720_s0 + $0x38] sm:$0xff]  ;;  %v453_v56 = vld [vmem:[%s721_s3] sm:$0xff]  }
   0x4   :  { %49 = vadd.xlane.f32.xlu1 %v48_v4  ;;  %v54_v14 = vsel %vm35_vm0, %v33_v12, 0.0  ;;  %v57_v15 = vsel %vm35_vm0, %v34_v13, 0.0  ;;  %437 = vmatprep.subr.bf16.mxu0 %v453_v56  ;;  %v454_v57 = vld [vmem:[%s721_s3 + $0x8] sm:$0xff]  }
   0x5   :  { %449 = vmatprep.subr.bf16.mxu1 %v453_v56  ;;  %438 = vmatpush3.bf16.msra.mxu0 %v453_v56 }
   0x6   :  { %451 = vmatpush3.bf16.msra.mxu1 %v453_v56  ;;  %439 = vmatprep.subr.bf16.mxu0 %v454_v57 }
   0x7   :  { %40 = vadd.xlane.f32.xlu0 %v39_v6  ;;  %450 = vmatprep.subr.bf16.mxu1 %v454_v57 }
   0x8   :  { %52 = vadd.xlane.f32.xlu1 %v51_v7 }
   0x9   :  { %440 = vmatpush3.bf16.msra.mxu0 %v454_v57 }
   0xa   :  { %452 = vmatpush3.bf16.msra.mxu1 %v454_v57 }
   0xb   :  { %43 = vadd.xlane.f32.xlu0 %v42_v10 }
   0xc   :  { %46 = vadd.xlane.f32.xlu1 %v45_v11 }
   0xf   :  { %55 = vadd.xlane.f32.xlu0 %v54_v14 }
  0x10   :  { %58 = vadd.xlane.f32.xlu1 %v57_v15 }
  0x90   :  { %v38_v16 = vpop.xlane.xlu0 %37 }
  0x91   :  { %v50_v17 = vpop.xlane.xlu1 %49  ;;  %v60_v18 = vmul.f32 0.03125, %v38_v16 }
  0x92   :  { %v64_v19 = vmul.f32 0.03125, %v50_v17 }
  0x93   :  { %v559_v20 = vsub.f32 %v27_v0, %v60_v18 }
  0x94   :  { %v561_v21 = vsub.f32 %v31_v1, %v64_v19  ;;  %v41_v22 = vpop.xlane.xlu0 %40  ;;  %v420_v19 = vld [vmem:[%s722_s1] ss:$0 sm:$0xff] }
  0x95   :  { %v53_v23 = vpop.xlane.xlu1 %52  ;;  %v61_v24 = vmul.f32 0.03125, %v41_v22  ;;  %v76_v26 = vmul.f32 %v559_v20, %v559_v20 }
  0x96   :  { %v65_v25 = vmul.f32 0.03125, %v53_v23  ;;  %v80_v27 = vmul.f32 %v561_v21, %v561_v21 }
  0x97   :  { %v567_v28 = vsub.f32 %v28_v2, %v61_v24  ;;  %v84_v30 = vsel %vm35_vm0, %v76_v26, 0.0 }
  0x98   :  { %v569_v29 = vsub.f32 %v32_v5, %v65_v25  ;;  %85 = vadd.xlane.f32.xlu0 %v84_v30  ;;  %v44_v31 = vpop.xlane.xlu0 %43  ;;  %v96_v33 = vsel %vm35_vm0, %v80_v27, 0.0  ;;  %v421_v27 = vld [vmem:[%s723_s2] ss:$0 sm:$0xff] }
  0x99   :  { %v47_v32 = vpop.xlane.xlu1 %46  ;;  %v62_v34 = vmul.f32 0.03125, %v44_v31  ;;  %v77_v36 = vmul.f32 %v567_v28, %v567_v28 }
  0x9a   :  { %v63_v35 = vmul.f32 0.03125, %v47_v32  ;;  %v81_v37 = vmul.f32 %v569_v29, %v569_v29 }
  0x9b   :  { %v577_v38 = vsub.f32 %v29_v8, %v62_v34  ;;  %v87_v40 = vsel %vm35_vm0, %v77_v36, 0.0 }
  0x9c   :  { %v579_v39 = vsub.f32 %v30_v9, %v63_v35  ;;  %97 = vadd.xlane.f32.xlu0 %v96_v33  ;;  %88 = vadd.xlane.f32.xlu1 %v87_v40  ;;  %v56_v41 = vpop.xlane.xlu0 %55  ;;  %v99_v43 = vsel %vm35_vm0, %v81_v37, 0.0 }
  0x9d   :  { %v59_v42 = vpop.xlane.xlu1 %58  ;;  %v66_v44 = vmul.f32 0.03125, %v56_v41  ;;  %v78_v46 = vmul.f32 %v577_v38, %v577_v38 }
  0x9e   :  { %v67_v45 = vmul.f32 0.03125, %v59_v42  ;;  %v79_v47 = vmul.f32 %v579_v39, %v579_v39 }
  0x9f   :  { %v587_v48 = vsub.f32 %v33_v12, %v66_v44  ;;  %v90_v50 = vsel %vm35_vm0, %v78_v46, 0.0 }
  0xa0   :  { %v589_v49 = vsub.f32 %v34_v13, %v67_v45  ;;  %100 = vadd.xlane.f32.xlu1 %v99_v43  ;;  %91 = vadd.xlane.f32.xlu0 %v90_v50  ;;  %v93_v51 = vsel %vm35_vm0, %v79_v47, 0.0 }
  0xa1   :  { %v82_v52 = vmul.f32 %v587_v48, %v587_v48 }
  0xa2   :  { %v83_v53 = vmul.f32 %v589_v49, %v589_v49 }
  0xa3   :  { %v102_v54 = vsel %vm35_vm0, %v82_v52, 0.0 }
  0xa4   :  { %94 = vadd.xlane.f32.xlu1 %v93_v51  ;;  %103 = vadd.xlane.f32.xlu0 %v102_v54  ;;  %v105_v55 = vsel %vm35_vm0, %v83_v53, 0.0 }
  0xa8   :  { %106 = vadd.xlane.f32.xlu1 %v105_v55 }
 0x125   :  { %v86_v58 = vpop.xlane.xlu0 %85 }
 0x126   :  { %v108_v59 = vmul.f32 0.03125, %v86_v58 }
 0x128   :  { %v116_v60 = vadd.f32 1e-05, %v108_v59 }
 0x129   :  { %v89_v61 = vpop.xlane.xlu1 %88  ;;  %v98_v62 = vpop.xlane.xlu0 %97 }
 0x12a   :  { %455 = vrsqrt.f32 %v116_v60  ;;  %v109_v63 = vmul.f32 0.03125, %v89_v61  ;;  %v112_v0 = vmul.f32 0.03125, %v98_v62 }
 0x12c   :  { %v117_v1 = vadd.f32 1e-05, %v109_v63  ;;  %v120_v2 = vadd.f32 1e-05, %v112_v0 }
 0x12d   :  { %v101_v3 = vpop.xlane.xlu1 %100  ;;  %v92_v4 = vpop.xlane.xlu0 %91 }
 0x12e   :  { %457 = vrsqrt.f32 %v117_v1  ;;  %v113_v5 = vmul.f32 0.03125, %v101_v3  ;;  %v110_v6 = vmul.f32 0.03125, %v92_v4 }
 0x12f   :  { %459 = vrsqrt.f32 %v120_v2 }
 0x130   :  { %v121_v7 = vadd.f32 1e-05, %v113_v5  ;;  %v118_v8 = vadd.f32 1e-05, %v110_v6 }
 0x131   :  { %v95_v9 = vpop.xlane.xlu1 %94  ;;  %v104_v10 = vpop.xlane.xlu0 %103 }
 0x132   :  { %461 = vrsqrt.f32 %v121_v7  ;;  %v111_v11 = vmul.f32 0.03125, %v95_v9  ;;  %v114_v12 = vmul.f32 0.03125, %v104_v10 }
 0x133   :  { %463 = vrsqrt.f32 %v118_v8 }
 0x134   :  { %v456_v13 = vpop.eup %455  ;;  %v119_v14 = vadd.f32 1e-05, %v111_v11  ;;  %v122_v15 = vadd.f32 1e-05, %v114_v12 }
 0x135   :  { %v107_v16 = vpop.xlane.xlu1 %106  ;;  %v132_v17 = vmul.f32 %v456_v13, %v559_v20 }
 0x136   :  { %465 = vrsqrt.f32 %v119_v14  ;;  %v115_v18 = vmul.f32 0.03125, %v107_v16 }
 0x137   :  { %467 = vrsqrt.f32 %v122_v15  ;;  %v147_v26 = vmul.f32 %v420_v19, %v132_v17 }
 0x138   :  { %v458_v22 = vpop.eup %457  ;;  %v123_v23 = vadd.f32 1e-05, %v115_v18 }
 0x139   :  { %v460_v24 = vpop.eup %459  ;;  %v133_v25 = vmul.f32 %v458_v22, %v567_v28  ;;  %v162_v33 = vadd.f32 %v421_v27, %v147_v26 }
 0x13a   :  { %469 = vrsqrt.f32 %v123_v23  ;;  %v136_v20 = vmul.f32 %v460_v24, %v561_v21 }
 0x13b   :  { %v148_v30 = vmul.f32 %v420_v19, %v133_v25 }
 0x13c   :  { %v462_v31 = vpop.eup %461  ;;  %v151_v36 = vmul.f32 %v420_v19, %v136_v20 }
 0x13d   :  { %v464_v32 = vpop.eup %463  ;;  %v163_v34 = vadd.f32 %v421_v27, %v148_v30  ;;  %v137_v35 = vmul.f32 %v462_v31, %v569_v29 }
 0x13e   :  { %v134_v37 = vmul.f32 %v464_v32, %v577_v38  ;;  %v166_v44 = vadd.f32 %v421_v27, %v151_v36 }
 0x13f   :  { %v170_v40 = vpack.c.bf16 %v163_v34, %v162_v33  ;;  %v152_v28 = vmul.f32 %v420_v19, %v137_v35 }
 0x140   :  { %v466_v41 = vpop.eup %465  ;;  %v149_v45 = vmul.f32 %v420_v19, %v134_v37 }
 0x141   :  { %v468_v42 = vpop.eup %467  ;;  %v135_v43 = vmul.f32 %v466_v41, %v579_v39  ;;  %441 = vmatprep.mubr.msk.bf16.mxu0 %vm35_vm0, %v170_v40  ;;  %v167_v21 = vadd.f32 %v421_v27, %v152_v28 }
 0x142   :  { %v138_v46 = vmul.f32 %v468_v42, %v587_v48  ;;  %v164_v38 = vadd.f32 %v421_v27, %v149_v45  ;;  %v422_v48 = vld [vmem:[%s724_s4] ss:$0 sm:$0xff] }
 0x143   :  { %v172_v47 = vpack.c.bf16 %v167_v21, %v166_v44  ;;  %v150_v50 = vmul.f32 %v420_v19, %v135_v43 }
 0x144   :  { %v470_v51 = vpop.eup %469  ;;  %v153_v53 = vmul.f32 %v420_v19, %v138_v46 }
 0x145   :  { %v139_v29 = vmul.f32 %v470_v51, %v589_v49  ;;  %445 = vmatprep.mubr.msk.bf16.mxu1 %vm35_vm0, %v172_v47  ;;  %v165_v52 = vadd.f32 %v421_v27, %v150_v50 }
 0x146   :  { %v168_v39 = vadd.f32 %v421_v27, %v153_v53 }
 0x147   :  { %v171_v54 = vpack.c.bf16 %v165_v52, %v164_v38  ;;  %v154_v55 = vmul.f32 %v420_v19, %v139_v29 }
 0x149   :  { %442 = vmatmul.mubr.msk.bf16.vlgmr.msra.gmra.mrb[0].mxu0 %vm35_vm0, %v171_v54  ;;  %v169_v56 = vadd.f32 %v421_v27, %v154_v55 }
 0x14b   :  { %v173_v57 = vpack.c.bf16 %v169_v56, %v168_v39 }
 0x14d   :  { %446 = vmatmul.mubr.msk.bf16.vlgmr.msra.gmra.mrb[0].mxu1 %vm35_vm0, %v173_v57 }
 0x21c   :  { %v443_v58 = vpop.f32.mrb[0].mxu0 }
 0x21d   :  { %v252_v49 = vadd.f32 %v443_v58, %v422_v48  ;;  %v243_v59 = vpop.f32.mrb[1].mxu0 }
 0x21e   :  { %v444_v60 = vpop.f32.mrb[2].mxu0  ;;  %v244_v61 = vadd.f32 %v422_v48, %v243_v59 }
 0x21f   :  { %v255_v62 = vadd.f32 %v444_v60, %v422_v48  ;;  %v246_v63 = vpop.f32.mrb[3].mxu0  ;;  %v280_v0 = vsel %vm35_vm0, %v252_v49, 0.0 }
 0x220   :  { %281 = vadd.xlane.f32.xlu0 %v280_v0  ;;  %v447_v1 = vpop.f32.mrb[0].mxu1  ;;  %v247_v2 = vadd.f32 %v422_v48, %v246_v63  ;;  %v274_v8 = vsel %vm35_vm0, %v244_v61, 0.0 }
 0x221   :  { %v259_v3 = vpop.f32.mrb[1].mxu1  ;;  %v283_v4 = vsel %vm35_vm0, %v255_v62, 0.0  ;;  %v268_v11 = vadd.f32 %v447_v1, %v422_v48 }
 0x222   :  { %284 = vadd.xlane.f32.xlu1 %v283_v4  ;;  %v448_v5 = vpop.f32.mrb[2].mxu1  ;;  %v260_v6 = vadd.f32 %v422_v48, %v259_v3  ;;  %v277_v10 = vsel %vm35_vm0, %v247_v2, 0.0 }
 0x223   :  { %v262_v7 = vpop.f32.mrb[3].mxu1  ;;  %v271_v13 = vadd.f32 %v448_v5, %v422_v48  ;;  %v292_v15 = vsel %vm35_vm0, %v268_v11, 0.0 }
 0x224   :  { %275 = vadd.xlane.f32.xlu0 %v274_v8  ;;  %v263_v9 = vadd.f32 %v422_v48, %v262_v7  ;;  %v286_v12 = vsel %vm35_vm0, %v260_v6, 0.0 }
 0x225   :  { %v295_v16 = vsel %vm35_vm0, %v271_v13, 0.0 }
 0x226   :  { %278 = vadd.xlane.f32.xlu1 %v277_v10  ;;  %v289_v14 = vsel %vm35_vm0, %v263_v9, 0.0 }
 0x228   :  { %287 = vadd.xlane.f32.xlu0 %v286_v12 }
 0x22a   :  { %290 = vadd.xlane.f32.xlu1 %v289_v14 }
 0x22c   :  { %293 = vadd.xlane.f32.xlu0 %v292_v15  ;;  %v429_v15 = vld [vmem:[%s725_s5] ss:$0 sm:$0xff] }
 0x22e   :  { %296 = vadd.xlane.f32.xlu1 %v295_v16 }
 0x2ad   :  { %v282_v17 = vpop.xlane.xlu0 %281 }
 0x2ae   :  { %v300_v18 = vmul.f32 0.03125, %v282_v17 }
 0x2af   :  { %v285_v19 = vpop.xlane.xlu1 %284 }
 0x2b0   :  { %v634_v22 = vsub.f32 %v252_v49, %v300_v18  ;;  %v301_v23 = vmul.f32 0.03125, %v285_v19 }
 0x2b1   :  { %v276_v24 = vpop.xlane.xlu0 %275 }
 0x2b2   :  { %v636_v25 = vsub.f32 %v255_v62, %v301_v23  ;;  %v298_v26 = vmul.f32 0.03125, %v276_v24  ;;  %v316_v27 = vmul.f32 %v634_v22, %v634_v22  ;;  %v430_v23 = vld [vmem:[%s726_s6] ss:$0 sm:$0xff] }
 0x2b3   :  { %v279_v20 = vpop.xlane.xlu1 %278 }
 0x2b4   :  { %v640_v30 = vsub.f32 %v244_v61, %v298_v26  ;;  %v299_v31 = vmul.f32 0.03125, %v279_v20  ;;  %v328_v32 = vsel %vm35_vm0, %v316_v27, 0.0  ;;  %v317_v33 = vmul.f32 %v636_v25, %v636_v25 }
 0x2b5   :  { %329 = vadd.xlane.f32.xlu0 %v328_v32  ;;  %v288_v34 = vpop.xlane.xlu0 %287 }
 0x2b6   :  { %v645_v35 = vsub.f32 %v247_v2, %v299_v31  ;;  %v302_v36 = vmul.f32 0.03125, %v288_v34  ;;  %v331_v37 = vsel %vm35_vm0, %v317_v33, 0.0  ;;  %v314_v40 = vmul.f32 %v640_v30, %v640_v30 }
 0x2b7   :  { %332 = vadd.xlane.f32.xlu1 %v331_v37  ;;  %v291_v28 = vpop.xlane.xlu1 %290 }
 0x2b8   :  { %v650_v41 = vsub.f32 %v260_v6, %v302_v36  ;;  %v303_v42 = vmul.f32 0.03125, %v291_v28  ;;  %v322_v43 = vsel %vm35_vm0, %v314_v40, 0.0  ;;  %v315_v44 = vmul.f32 %v645_v35, %v645_v35 }
 0x2b9   :  { %323 = vadd.xlane.f32.xlu0 %v322_v43  ;;  %v294_v21 = vpop.xlane.xlu0 %293 }
 0x2ba   :  { %v655_v45 = vsub.f32 %v263_v9, %v303_v42  ;;  %v304_v46 = vmul.f32 0.03125, %v294_v21  ;;  %v325_v47 = vsel %vm35_vm0, %v315_v44, 0.0  ;;  %v318_v50 = vmul.f32 %v650_v41, %v650_v41 }
 0x2bb   :  { %326 = vadd.xlane.f32.xlu1 %v325_v47  ;;  %v297_v51 = vpop.xlane.xlu1 %296 }
 0x2bc   :  { %v660_v29 = vsub.f32 %v268_v11, %v304_v46  ;;  %v305_v38 = vmul.f32 0.03125, %v297_v51  ;;  %v334_v52 = vsel %vm35_vm0, %v318_v50, 0.0  ;;  %v319_v53 = vmul.f32 %v655_v45, %v655_v45 }
 0x2bd   :  { %335 = vadd.xlane.f32.xlu0 %v334_v52 }
 0x2be   :  { %v665_v54 = vsub.f32 %v271_v13, %v305_v38  ;;  %v337_v55 = vsel %vm35_vm0, %v319_v53, 0.0  ;;  %v320_v39 = vmul.f32 %v660_v29, %v660_v29 }
 0x2bf   :  { %338 = vadd.xlane.f32.xlu1 %v337_v55 }
 0x2c0   :  { %v340_v56 = vsel %vm35_vm0, %v320_v39, 0.0  ;;  %v321_v57 = vmul.f32 %v665_v54, %v665_v54 }
 0x2c1   :  { %341 = vadd.xlane.f32.xlu0 %v340_v56 }
 0x2c2   :  { %v343_v48 = vsel %vm35_vm0, %v321_v57, 0.0 }
 0x2c3   :  { %344 = vadd.xlane.f32.xlu1 %v343_v48 }
 0x342   :  { %v330_v58 = vpop.xlane.xlu0 %329 }
 0x343   :  { %v348_v49 = vmul.f32 0.03125, %v330_v58 }
 0x344   :  { %v333_v59 = vpop.xlane.xlu1 %332 }
 0x345   :  { %v356_v60 = vadd.f32 1e-05, %v348_v49  ;;  %v349_v61 = vmul.f32 0.03125, %v333_v59 }
 0x346   :  { %v324_v62 = vpop.xlane.xlu0 %323 }
 0x347   :  { %471 = vrsqrt.f32 %v356_v60  ;;  %v357_v63 = vadd.f32 1e-05, %v349_v61  ;;  %v346_v0 = vmul.f32 0.03125, %v324_v62 }
 0x348   :  { %v327_v1 = vpop.xlane.xlu1 %326 }
 0x349   :  { %473 = vrsqrt.f32 %v357_v63  ;;  %v354_v2 = vadd.f32 1e-05, %v346_v0  ;;  %v347_v3 = vmul.f32 0.03125, %v327_v1 }
 0x34a   :  { %v336_v4 = vpop.xlane.xlu0 %335 }
 0x34b   :  { %475 = vrsqrt.f32 %v354_v2  ;;  %v355_v5 = vadd.f32 1e-05, %v347_v3  ;;  %v350_v6 = vmul.f32 0.03125, %v336_v4 }
 0x34c   :  { %v339_v7 = vpop.xlane.xlu1 %338 }
 0x34d   :  { %477 = vrsqrt.f32 %v355_v5  ;;  %v358_v8 = vadd.f32 1e-05, %v350_v6  ;;  %v351_v9 = vmul.f32 0.03125, %v339_v7 }
 0x34e   :  { %v342_v10 = vpop.xlane.xlu0 %341 }
 0x34f   :  { %479 = vrsqrt.f32 %v358_v8  ;;  %v359_v11 = vadd.f32 1e-05, %v351_v9  ;;  %v352_v12 = vmul.f32 0.03125, %v342_v10 }
 0x350   :  { %v345_v13 = vpop.xlane.xlu1 %344 }
 0x351   :  { %v472_v14 = vpop.eup %471  ;;  %481 = vrsqrt.f32 %v359_v11  ;;  %v360_v16 = vadd.f32 1e-05, %v352_v12  ;;  %v353_v17 = vmul.f32 0.03125, %v345_v13 }
 0x352   :  { %v372_v18 = vmul.f32 %v472_v14, %v634_v22 }
 0x353   :  { %v474_v19 = vpop.eup %473  ;;  %483 = vrsqrt.f32 %v360_v16  ;;  %v361_v24 = vadd.f32 1e-05, %v353_v17 }
 0x354   :  { %v387_v26 = vmul.f32 %v429_v15, %v372_v18  ;;  %v373_v27 = vmul.f32 %v474_v19, %v636_v25 }
 0x355   :  { %v476_v20 = vpop.eup %475  ;;  %485 = vrsqrt.f32 %v361_v24 }
 0x356   :  { %v402_v31 = vadd.f32 %v430_v23, %v387_v26  ;;  %v388_v32 = vmul.f32 %v429_v15, %v373_v27  ;;  %v370_v33 = vmul.f32 %v476_v20, %v640_v30 }
 0x357   :  { %v478_v34 = vpop.eup %477 }
 0x358   :  { %410 = vst.msk [vmem:[%s727_s7 + $0x10] sm:$0xff] %vm35_vm0, %v402_v31  ;;  %v403_v22 = vadd.f32 %v430_v23, %v388_v32  ;;  %v385_v36 = vmul.f32 %v429_v15, %v370_v33  ;;  %v371_v37 = vmul.f32 %v478_v34, %v645_v35 }
 0x359   :  { %v480_v40 = vpop.eup %479 }
 0x35a   :  { %411 = vst.msk [vmem:[%s727_s7 + $0x18] sm:$0xff] %vm35_vm0, %v403_v22  ;;  %v400_v25 = vadd.f32 %v430_v23, %v385_v36  ;;  %v386_v28 = vmul.f32 %v429_v15, %v371_v37  ;;  %v374_v30 = vmul.f32 %v480_v40, %v650_v41 }
 0x35b   :  { %v482_v42 = vpop.eup %481 }
 0x35c   :  { %408 = vst.msk [vmem:[%s727_s7] sm:$0xff] %vm35_vm0, %v400_v25  ;;  %v401_v43 = vadd.f32 %v430_v23, %v386_v28  ;;  %v389_v44 = vmul.f32 %v429_v15, %v374_v30  ;;  %v375_v35 = vmul.f32 %v482_v42, %v655_v45 }
 0x35d   :  { %v484_v21 = vpop.eup %483 }
 0x35e   :  { %409 = vst.msk [vmem:[%s727_s7 + $0x8] sm:$0xff] %vm35_vm0, %v401_v43  ;;  %v404_v46 = vadd.f32 %v430_v23, %v389_v44  ;;  %v390_v47 = vmul.f32 %v429_v15, %v375_v35  ;;  %v376_v41 = vmul.f32 %v484_v21, %v660_v29 }
 0x35f   :  { %v486_v50 = vpop.eup %485 }
 0x360   :  { %412 = vst.msk [vmem:[%s727_s7 + $0x20] sm:$0xff] %vm35_vm0, %v404_v46  ;;  %v405_v51 = vadd.f32 %v430_v23, %v390_v47  ;;  %v391_v38 = vmul.f32 %v429_v15, %v376_v41  ;;  %v377_v45 = vmul.f32 %v486_v50, %v665_v54 }
 0x362   :  { %413 = vst.msk [vmem:[%s727_s7 + $0x28] sm:$0xff] %vm35_vm0, %v405_v51  ;;  %v406_v52 = vadd.f32 %v430_v23, %v391_v38  ;;  %v392_v53 = vmul.f32 %v429_v15, %v377_v45 }
 0x364   :  { %414 = vst.msk [vmem:[%s727_s7 + $0x30] sm:$0xff] %vm35_vm0, %v406_v52  ;;  %v407_v29 = vadd.f32 %v430_v23, %v392_v53 }
 0x366   :  { %415 = vst.msk [vmem:[%s727_s7 + $0x38] sm:$0xff] %vm35_vm0, %v407_v29 }

// kernel: _lambda_.4
= control target key start
LH: loop header
LB: loop body
LE: loop exit
PB: predicated region body
PF: predicated region fallthrough
CT: control target
= control target key end

     0   :  { %vm29_vm0 = vcmask 23552   ;;  %s292_s0 = inlined_call_operand.vmem [shape: f32[8,3], index: 0, kind: input, shape index: {}]   ;;  %s293_s1 = inlined_call_operand.vmem [shape: f32[1,3], index: 1, kind: input, shape index: {}]   ;;  %s294_s2 = inlined_call_operand.vmem [shape: f32[1,3], index: 2, kind: input, shape index: {}]   ;;  %s295_s3 = inlined_call_operand.vmem [shape: bf16[3,32], index: 3, kind: input, shape index: {}]   ;;  %s296_s4 = inlined_call_operand.vmem [shape: f32[1,32], index: 4, kind: input, shape index: {}]   ;;  %s297_s5 = inlined_call_operand.vmem [shape: f32[1,32], index: 5, kind: input, shape index: {}]   ;;  %s298_s6 = inlined_call_operand.vmem [shape: f32[1,32], index: 6, kind: input, shape index: {}]   ;;  %s299_s7 = inlined_call_operand.hbm [shape: f32[8,32], index: 7, kind: output, shape index: {}]  }
   0x1   :  { %v28_v0 = vld [vmem:[%s292_s0] sm:$0xff] }
   0x2   :  { %12 = vsyncpa [#allocation3], 0  ;;  %v30_v1 = vsel %vm29_vm0, %v28_v0, 0.0  ;;  %v60_v7 = vld [vmem:[%s295_s3] sm:$0x3]  ;;  %vm71_vm1 = vcmask 1040384  }
   0x3   :  { %31 = vadd.xlane.f32.xlu0 %v30_v1  ;;  %vm72_vm2 = vcmask 1041408   ;;  %v209_v8 = vmov 0.0   ;;  %v210_v9 = vmov 65535   ;;  %vm211_vm3 = vmmov 0   ;;  %v163_v17 = vld [vmem:[%s293_s1] ss:$0 sm:$0xff] }
   0x4   :  { %171 = vmatprep.subr.bf16.mxu0 %v209_v8  ;;  %v73_v10 = vsel %vm71_vm1, 4294967295, %v210_v9  ;;  %173 = vmatprep.mubr.msk.bf16.mxu0 %vm211_vm3, %v209_v8  ;;  %v164_v19 = vld [vmem:[%s294_s2] ss:$0 sm:$0xff]  ;;  %vm118_vm4 = vcmask 261120   ;;  %s212_s10 = smov [#allocation2]  }
   0x5   :  { %v74_v11 = vsel %vm72_vm2, %v73_v10, 0  ;;  %v165_v23 = vld [vmem:[%s296_s4] ss:$0 sm:$0xff]  ;;  %s155_s11 = sshll.u32 %s212_s10, 4  ;;  %s156_s11 = int_to_ptr.vmem [resolvable:$true] %s155_s11 }
   0x6   :  { %v76_v12 = vand.u32 %v74_v11, %v60_v7  ;;  %v167_v39 = vld [vmem:[%s297_s5] ss:$0 sm:$0xff]  ;;  %s185_s12 = scalar_lea.vmem %s156_s11, 128  ;;  %p190_p1 = scmp.lt.s32.totalorder %s156_s11, %s156_s11 }
   0x7   :  { %v168_v41 = vld [vmem:[%s298_s6] ss:$0 sm:$0xff]  ;;  %p186_p0 = scmp.ne.s32.totalorder %s156_s11, %s185_s12  ;;  %p191_p2 = scmp.lt.s32.totalorder %s185_s12, %s185_s12 }
   0x8   :  { %172 = vmatpush3.bf16.msra.mxu0 %v76_v12 }
   0x9   :  { %p192_p3 = por %p191_p2, %p190_p1 }
   0xb   :  { %p193_p4 = pnand %p192_p3, %p186_p0 }
  0x90   :  { %v32_v2 = vpop.xlane.xlu0 %31 }
  0x91   :  { %v33_v3 = vmul.f32 0.33333334, %v32_v2 }
  0x93   :  { %v34_v4 = vsub.f32 %v28_v0, %v33_v3 }
  0x95   :  { %v35_v5 = vmul.f32 %v34_v4, %v34_v4 }
  0x97   :  { %v36_v6 = vsel %vm29_vm0, %v35_v5, 0.0 }
  0x98   :  { %37 = vadd.xlane.f32.xlu0 %v36_v6 }
 0x125   :  { %v38_v13 = vpop.xlane.xlu0 %37 }
 0x126   :  { %v39_v14 = vmul.f32 0.33333334, %v38_v13 }
 0x128   :  { %v40_v15 = vadd.f32 1e-05, %v39_v14 }
 0x12a   :  { %181 = vrsqrt.f32 %v40_v15 }
 0x134   :  { %v182_v16 = vpop.eup %181 }
 0x135   :  { %v42_v18 = vmul.f32 %v182_v16, %v34_v4 }
 0x137   :  { %v50_v20 = vmul.f32 %v163_v17, %v42_v18 }
 0x139   :  { %v58_v21 = vadd.f32 %v164_v19, %v50_v20 }
 0x13b   :  { %v59_v22 = vpack.c.bf16 %v58_v21, %v58_v21 }
 0x13d   :  { %174 = vmatmul.mubr.msk.bf16.vlgmr.msra.gmra.mrb[0].mxu0 %vm29_vm0, %v59_v22 }
 0x210   :  { %v112_v24 = vpop.f32.mrb[0].mxu0 }
 0x211   :  { %v113_v25 = vadd.f32 %v165_v23, %v112_v24  ;;  %v175_v26 = vpop.f32.mrb[1].mxu0 }
 0x212   :  { %v115_v27 = vpop.f32.mrb[2].mxu0 }
 0x213   :  { %v176_v28 = vpop.f32.mrb[3].mxu0  ;;  %v119_v29 = vsel %vm118_vm4, %v113_v25, 0.0 }
 0x214   :  { %120 = vadd.xlane.f32.xlu1 %v119_v29 }
 0x2a1   :  { %v121_v30 = vpop.xlane.xlu1 %120 }
 0x2a2   :  { %v122_v31 = vmul.f32 0.03125, %v121_v30 }
 0x2a4   :  { %v123_v32 = vsub.f32 %v113_v25, %v122_v31 }
 0x2a6   :  { %v124_v33 = vmul.f32 %v123_v32, %v123_v32 }
 0x2a8   :  { %v125_v34 = vsel %vm118_vm4, %v124_v33, 0.0 }
 0x2a9   :  { %126 = vadd.xlane.f32.xlu1 %v125_v34 }
 0x336   :  { %v127_v35 = vpop.xlane.xlu1 %126 }
 0x337   :  { %v128_v36 = vmul.f32 0.03125, %v127_v35 }
 0x339   :  { %v129_v37 = vadd.f32 1e-05, %v128_v36 }
 0x33b   :  { %183 = vrsqrt.f32 %v129_v37 }
 0x345   :  { %v184_v38 = vpop.eup %183 }
 0x346   :  { %v131_v40 = vmul.f32 %v184_v38, %v123_v32 }
 0x348   :  { %v139_v42 = vmul.f32 %v167_v39, %v131_v40 }
 0x34a   :  { %v147_v43 = vadd.f32 %v168_v41, %v139_v42 }
 0x34c   :  { %148 = vst.msk [vmem:[#allocation2] sm:$0xff] %vm118_vm4, %v147_v43 }
 0x34d   :  { %196 = shalt.err (!%p193_p4)
}
 0x34e   :  { %s197_s14 = scalar_lea.hbm %s299_s7, 128 }
 0x34f   :  { %p198_p5 = scmp.ne.s32.totalorder %s299_s7, %s197_s14  ;;  %p201_p6 = scmp.lt.u32.totalorder %s197_s14, %s299_s7 }
 0x351   :  { %p203_p7 = pnand %p201_p6, %p198_p5 }
 0x353   :  { %206 = shalt.err (!%p203_p7)
}
 0x354   :  { %158 = dma.vmem_to_hbm [thread:$0]  %s156_s11, 128, %s299_s7, [#allocation3]  }
 0x355   :  { %207 = dma.done.wait [#allocation3], 128  }
 0x356   :  { %208 = vsyncadd [#allocation3], 4294967168 }
 0x357   :  { %162 = vsyncpa [#allocation3], 1 }

</bundles_post_ra>
